<compile_context>
chip_gen: v7x
topology: tpu7x:2x2x1
jax: 0.10.0
libtpu: 0.0.40
codegen_flags: <defaults>
</compile_context>

<pallas_src>
import functools

import jax
import jax.numpy as jnp
from jax.experimental import pallas as pl
from jax.experimental.pallas import tpu as pltpu

_BN_EPS = 1e-5


def _round_up(x, k):
    return ((x + k - 1) // k) * k


def _pick_tile(m_pad, *, max_tile=1024, min_grid=4):
    """Largest lane-dense (multiple-of-128) tile dividing m_pad that still
    leaves >= min_grid grid steps (DMA/compute pipelining + v7x 2-core
    sharding of the 'parallel' axis); relax to >=2 steps, then 1."""
    cands = [t for t in (1024, 512, 256, 128)
             if t <= max_tile and m_pad % t == 0]
    for want in (min_grid, 2, 1):
        for t in cands:
            if m_pad // t >= want:
                return t
    return 128  # unreachable: m_pad is always a multiple of 128


def _sublane_fill_factor(c, m):
    """Smallest k with (c*k) % 8 == 0, m % k == 0 and (m//k) % 128 == 0 so the
    elementwise tiles use full (8,128) vregs; 1 if no such k exists."""
    if c % 8 == 0:
        return 1
    for k in (2, 4, 8):
        if (c * k) % 8 == 0 and m % k == 0 and (m // k) % 128 == 0:
            return k
    return 1


# ---------------------------------------------------------------------------
# Pallas kernel 1: conv-as-GEMM (bf16 operands, f32 accumulate) with fused
# per-channel sum / sum-of-squares epilogue (no bias: BN cancels it exactly).
#   h[Cout, TM]   = W[Cout, K] @ X_col[K, TM]
#   s1[Cout, 1]   = sum_M h  (this tile)     s2[Cout, 1] = sum_M h^2
# ---------------------------------------------------------------------------
def _conv_gemm_stats_kernel(w_ref, x_ref, h_ref, s1_ref, s2_ref):
    acc = jnp.dot(w_ref[...], x_ref[...], preferred_element_type=jnp.float32)
    h_ref[...] = acc
    cout = acc.shape[0]
    s1_ref[...] = jnp.sum(acc, axis=1, keepdims=True).reshape(1, cout, 1)
    s2_ref[...] = jnp.sum(acc * acc, axis=1, keepdims=True).reshape(1, cout, 1)


# ---------------------------------------------------------------------------
# Pallas kernel 2: fused BatchNorm-apply + PReLU (+ optional *scale + residual)
#   z = h * scale_c + shift_c ; z = PReLU(z) ; [z = z*out_scale + res]
# ---------------------------------------------------------------------------
def _make_bn_act_kernel(alpha, out_scale, with_residual):
    alpha = float(alpha)
    out_scale = float(out_scale)

    def _act(z):
        return jnp.where(z >= 0.0, z, alpha * z)

    if with_residual:
        def kernel(h_ref, r_ref, sc_ref, sh_ref, o_ref):
            z = _act(h_ref[...] * sc_ref[...] + sh_ref[...])
            if out_scale != 1.0:          # skip the extra full-tile pass when scale==1
                z = z * out_scale
            o_ref[...] = (z + r_ref[...]).astype(o_ref.dtype)
    else:
        def kernel(h_ref, sc_ref, sh_ref, o_ref):
            z = _act(h_ref[...] * sc_ref[...] + sh_ref[...])
            o_ref[...] = z.astype(o_ref.dtype)
    return kernel


# ---------------------------------------------------------------------------
# JAX glue: im2col directly in kernel-native (K, M) order (bf16).
# ---------------------------------------------------------------------------
def _im2col_kmajor(x_cnhw, kh, kw, stride, padding, dilation):
    """x_cnhw: (C, N, H, W) -> X_col (C*kh*kw, N*Ho*Wo), Ho, Wo.  K order is
    (c, i, j) matching weight.reshape(Cout, C*kh*kw); M order is (n, ho, wo).
    Built directly in (K, M) order so the final reshape is free."""
    c, n, h, w = x_cnhw.shape
    eff_kh = (kh - 1) * dilation + 1
    eff_kw = (kw - 1) * dilation + 1
    ho = (h + 2 * padding - eff_kh) // stride + 1
    wo = (w + 2 * padding - eff_kw) // stride + 1
    xp = jnp.pad(x_cnhw, ((0, 0), (0, 0), (padding, padding), (padding, padding)))
    patches = []
    for i in range(kh):
        for j in range(kw):
            hi, wj = i * dilation, j * dilation
            patches.append(
                xp[:, :, hi:hi + stride * (ho - 1) + 1:stride,
                         wj:wj + stride * (wo - 1) + 1:stride])  # (C, N, Ho, Wo)
    x_col = jnp.stack(patches, axis=1)               # (C, kh*kw, N, Ho, Wo)
    return x_col.reshape(c * kh * kw, n * ho * wo), ho, wo


def _conv2d_gemm_stats(x_cnhw_bf16, weight, stride, padding, dilation):
    """x_cnhw_bf16: (Cin, N, H, W) bf16; weight: (Cout, Cin, kh, kw).
    Returns (h f32 (Cout, M), scale_c (Cout,1), shift_c (Cout,1), Ho, Wo)
    where scale_c/shift_c fold the training-mode BatchNorm (gamma=1, beta=0)."""
    cout, cin, kh, kw = weight.shape
    x_col, ho, wo = _im2col_kmajor(x_cnhw_bf16, kh, kw, stride, padding, dilation)
    k, m = x_col.shape
    w_col = weight.reshape(cout, k).astype(jnp.bfloat16)
    x_col = x_col.astype(jnp.bfloat16)

    m_pad = _round_up(m, 128)
    if m_pad != m:  # not triggered at the demo shapes (M = 512)
        x_col = jnp.pad(x_col, ((0, 0), (0, m_pad - m)))
    tm = _pick_tile(m_pad)
    g = m_pad // tm

    h, st1, st2 = pl.pallas_call(
        _conv_gemm_stats_kernel,
        out_shape=(jax.ShapeDtypeStruct((cout, m_pad), jnp.float32),
                   jax.ShapeDtypeStruct((g, cout, 1), jnp.float32),
                   jax.ShapeDtypeStruct((g, cout, 1), jnp.float32)),
        grid_spec=pltpu.PrefetchScalarGridSpec(
            num_scalar_prefetch=0,
            grid=(g,),
            in_specs=[
                pl.BlockSpec((cout, k), lambda i: (0, 0)),   # weights, resident
                pl.BlockSpec((k, tm), lambda i: (0, i)),     # X_col tile (lane-dense M)
            ],
            out_specs=(
                pl.BlockSpec((cout, tm), lambda i: (0, i)),
                pl.BlockSpec((1, cout, 1), lambda i: (i, 0, 0)),
                pl.BlockSpec((1, cout, 1), lambda i: (i, 0, 0)),
            ),
        ),
        compiler_params=pltpu.CompilerParams(
            dimension_semantics=("parallel",),
            vmem_limit_bytes=32 * 1024 * 1024),
    )(w_col, x_col)

    # Tiny cross-tile reduction + BN fold (plain JAX; zero-padded M columns
    # contribute exactly 0 to both sums since there is no bias term).
    s1 = jnp.sum(st1[:, :, 0], axis=0)                 # (Cout,)
    s2 = jnp.sum(st2[:, :, 0], axis=0)
    inv_m = 1.0 / float(m)
    mu = s1 * inv_m
    var = s2 * inv_m - mu * mu                         # biased, as in BN training
    scale_c = jax.lax.rsqrt(var + _BN_EPS)             # gamma = 1
    shift_c = -mu * scale_c                            # beta  = 0

    if m_pad != m:
        h = h[:, :m]
    return h, scale_c.reshape(cout, 1), shift_c.reshape(cout, 1), ho, wo


def _bn_prelu(h, scale_c, shift_c, *, alpha, out_scale=1.0, residual=None):
    """h: (C, M) f32; scale_c/shift_c: (C, 1).  Applies the folded BatchNorm,
    PReLU and optionally the fused `* out_scale + residual` epilogue."""
    c, m = h.shape
    m_pad = _round_up(m, 128)
    if m_pad != m:  # not triggered at the demo shapes
        h = jnp.pad(h, ((0, 0), (0, m_pad - m)))
        if residual is not None:
            residual = jnp.pad(residual, ((0, 0), (0, m_pad - m)))

    # Sublane fill: view (C, M) as (C*k, M/k) -- a free row-major reshape --
    # so C=4 does not leave half of every (8,128) vreg / store masked.
    k = _sublane_fill_factor(c, m_pad)
    cv, mv = c * k, m_pad // k
    h_v = h.reshape(cv, mv)
    sc_v = jnp.repeat(scale_c.astype(jnp.float32), k, axis=0)    # (cv, 1)
    sh_v = jnp.repeat(shift_c.astype(jnp.float32), k, axis=0)

    tm = _pick_tile(mv)
    with_res = residual is not None
    kernel = _make_bn_act_kernel(alpha, out_scale, with_res)

    args = [h_v]
    in_specs = [pl.BlockSpec((cv, tm), lambda i: (0, i))]
    if with_res:
        args.append(residual.astype(jnp.float32).reshape(cv, mv))
        in_specs.append(pl.BlockSpec((cv, tm), lambda i: (0, i)))
    args += [sc_v, sh_v]
    in_specs += [pl.BlockSpec((cv, 1), lambda i: (0, 0)),
                 pl.BlockSpec((cv, 1), lambda i: (0, 0))]

    out = pl.pallas_call(
        kernel,
        out_shape=jax.ShapeDtypeStruct((cv, mv), jnp.float32),
        grid_spec=pltpu.PrefetchScalarGridSpec(
            num_scalar_prefetch=0,
            grid=(mv // tm,),
            in_specs=in_specs,
            out_specs=pl.BlockSpec((cv, tm), lambda i: (0, i)),
        ),
        compiler_params=pltpu.CompilerParams(
            dimension_semantics=("parallel",),
            vmem_limit_bytes=32 * 1024 * 1024),
    )(*args)

    out = out.reshape(c, m_pad)
    if m_pad != m:
        out = out[:, :m]
    return out


@functools.partial(jax.jit, static_argnames=("stride", "padding", "dilation",
                                              "res_scale", "prelu_alpha"))
def resnet_block_triple_forward(x, w1, b1, w2, b2, *, stride=1, padding=1,
                                dilation=1, res_scale=1.0, prelu_alpha=0.5):
    """ResnetBlock_triple forward.

    x: (N, Cin, H, W) NCHW f32; w1: (Cmid, Cin, kh, kw); b1: (Cmid,);
    w2: (Cout, Cmid, kh, kw); b2: (Cout,).  Returns (N, Cout, H, W).
    b1/b2 are accepted for API parity but intentionally unused: training-mode
    BatchNorm with batch statistics and beta=0 cancels a per-channel constant
    exactly (same as the PyTorch module), so feeding the bias to the GEMM
    would be pure wasted work."""
    n, cin, h, w = x.shape
    cmid = w1.shape[0]
    cout = w2.shape[0]
    assert cout == cin, "residual add requires output_size == input_size"
    _ = (b1, b2)  # cancelled by BatchNorm; see docstring

    x = x.astype(jnp.float32)
    x_cnhw = jnp.transpose(x, (1, 0, 2, 3))                  # (Cin, N, H, W)

    # conv1 (+ fused batch stats)  ->  fused BN + PReLU
    h1, sc1, sh1, ho, wo = _conv2d_gemm_stats(
        x_cnhw.astype(jnp.bfloat16), w1, stride, padding, dilation)
    a1 = _bn_prelu(h1, sc1, sh1, alpha=prelu_alpha)          # (Cmid, N*Ho*Wo)

    # conv2 (+ fused batch stats)  ->  fused BN + PReLU + *scale + residual
    a1_cnhw = a1.reshape(cmid, n, ho, wo)                    # free reshape
    h2, sc2, sh2, ho2, wo2 = _conv2d_gemm_stats(
        a1_cnhw.astype(jnp.bfloat16), w2, stride, padding, dilation)
    assert (ho2, wo2) == (h, w), "residual add requires 'same' conv shapes"
    res_flat = x_cnhw.reshape(cin, n * h * w)
    out = _bn_prelu(h2, sc2, sh2, alpha=prelu_alpha, out_scale=res_scale,
                    residual=res_flat)                       # (Cout, N*H*W)

    out = out.reshape(cout, n, ho2, wo2)
    return jnp.transpose(out, (1, 0, 2, 3))                  # back to NCHW


# ---------------------------------------------------------------------------
# Pure-JAX reference (independent path: lax.conv, WITH bias) for correctness.
# ---------------------------------------------------------------------------
def _reference_forward(x, w1, b1, w2, b2, *, stride, padding, dilation,
                       res_scale, prelu_alpha):
    def conv(z, wgt, b):
        out = jax.lax.conv_general_dilated(
            z, wgt, window_strides=(stride, stride),
            padding=[(padding, padding), (padding, padding)],
            rhs_dilation=(dilation, dilation),
            dimension_numbers=("NCHW", "OIHW", "NCHW"),
            precision=jax.lax.Precision.HIGHEST)
        return out + b[None, :, None, None]

    def bn(z):
        mu = jnp.mean(z, axis=(0, 2, 3), keepdims=True)
        var = jnp.var(z, axis=(0, 2, 3), keepdims=True)
        return (z - mu) * jax.lax.rsqrt(var + _BN_EPS)

    def prelu(z):
        return jnp.where(z >= 0, z, prelu_alpha * z)

    a1 = prelu(bn(conv(x, w1, b1)))
    a2 = prelu(bn(conv(a1, w2, b2)))
    return a2 * res_scale + x


if __name__ == "__main__":
    N, Cin, H, W = 2, 4, 16, 16
    Cmid, Cout = 8, 4
    ksize, stride, padding, dilation = 3, 1, 1, 1
    res_scale, prelu_alpha = 1.0, 0.5

    key = jax.random.PRNGKey(0)
    kx, k1, k2, k3, k4 = jax.random.split(key, 5)
    x = jax.random.normal(kx, (N, Cin, H, W), dtype=jnp.float32)
    w1 = 0.2 * jax.random.normal(k1, (Cmid, Cin, ksize, ksize), dtype=jnp.float32)
    b1 = 0.1 * jax.random.normal(k2, (Cmid,), dtype=jnp.float32)
    w2 = 0.2 * jax.random.normal(k3, (Cout, Cmid, ksize, ksize), dtype=jnp.float32)
    b2 = 0.1 * jax.random.normal(k4, (Cout,), dtype=jnp.float32)

    out = resnet_block_triple_forward(
        x, w1, b1, w2, b2, stride=stride, padding=padding, dilation=dilation,
        res_scale=res_scale, prelu_alpha=prelu_alpha)
    out = jax.block_until_ready(out)

    ref = _reference_forward(
        x, w1, b1, w2, b2, stride=stride, padding=padding, dilation=dilation,
        res_scale=res_scale, prelu_alpha=prelu_alpha)

    assert out.shape == (N, Cout, H, W), out.shape
    # Tolerance accommodates bf16 MXU operands (single-pass bf16 vs the
    # HIGHEST-precision f32 XLA conv reference) propagated through two convs;
    # any semantic error (conv indexing, BN stats, PReLU, residual, the
    # bias-cancellation assumption) would be O(0.1 .. 1).
    max_diff = float(jnp.max(jnp.abs(out - ref)))
    assert jnp.allclose(out, ref, atol=5e-2, rtol=5e-2), max_diff
    print("KERNEL_OK")
</pallas_src>

<mosaic_0001>
module attributes {stable_mosaic.version = 11 : i64} {
  func.func @_conv_gemm_stats_kernel(%arg0: i32, %arg1: memref<8x36xbf16, #tpu.memory_space<vmem>>, %arg2: memref<36x128xbf16, #tpu.memory_space<vmem>>, %arg3: memref<8x128xf32, #tpu.memory_space<vmem>>, %arg4: memref<1x8x1xf32, #tpu.memory_space<vmem>>, %arg5: memref<1x8x1xf32, #tpu.memory_space<vmem>>) attributes {dimension_semantics = [#tpu.dimension_semantics<parallel>], iteration_bounds = array<i64: 4>, scalar_prefetch = 0 : i64, scratch_operands = 0 : i64, tpu.core_type = #tpu.core_type<tc>, window_params = [{pipeline_mode = #tpu.pipeline_mode<synchronous>, transform_indices = @transform_0, window_bounds = array<i64: 8, 36>}, {transform_indices = @transform_1, window_bounds = array<i64: 36, 128>}, {transform_indices = @transform_2, window_bounds = array<i64: 8, 128>}, {transform_indices = @transform_3, window_bounds = array<i64: 1, 8, 1>}, {transform_indices = @transform_4, window_bounds = array<i64: 1, 8, 1>}]} {
    %c0 = arith.constant 0 : index
    %c0_0 = arith.constant 0 : index
    %0 = vector.load %arg1[%c0, %c0_0] : memref<8x36xbf16, #tpu.memory_space<vmem>>, vector<8x36xbf16>
    %c0_1 = arith.constant 0 : index
    %c0_2 = arith.constant 0 : index
    %1 = vector.load %arg2[%c0_1, %c0_2] : memref<36x128xbf16, #tpu.memory_space<vmem>>, vector<36x128xbf16>
    %cst = arith.constant dense<0.000000e+00> : vector<8x128xf32>
    %2 = tpu.matmul %0, %1, %cst {dimension_numbers = #tpu.dot_dimension_numbers<[1], [0], [0], [1], [0, 0, 1, 1], [], []>} : vector<8x36xbf16>, vector<36x128xbf16>, vector<8x128xf32> -> vector<8x128xf32>
    %c0_3 = arith.constant 0 : index
    %c0_4 = arith.constant 0 : index
    %3 = vector.load %arg3[%c0_3, %c0_4] : memref<8x128xf32, #tpu.memory_space<vmem>>, vector<8x128xf32>
    tpu.vector_store %arg3[%c0_3, %c0_4], %2 {strides = array<i32>} : memref<8x128xf32, #tpu.memory_space<vmem>>, vector<8x128xf32>,
    %cst_5 = arith.constant dense<0.000000e+00> : vector<8xf32>
    %4 = vector.multi_reduction <add>, %2, %cst_5 [1] : vector<8x128xf32> to vector<8xf32>
    %5 = vector.shape_cast %4 : vector<8xf32> to vector<8x1xf32>
    %6 = vector.shape_cast %5 : vector<8x1xf32> to vector<1x8x1xf32>
    %c0_6 = arith.constant 0 : index
    %c0_7 = arith.constant 0 : index
    %c0_8 = arith.constant 0 : index
    %7 = vector.load %arg4[%c0_6, %c0_7, %c0_8] : memref<1x8x1xf32, #tpu.memory_space<vmem>>, vector<1x8x1xf32>
    tpu.vector_store %arg4[%c0_6, %c0_7, %c0_8], %6 {strides = array<i32>} : memref<1x8x1xf32, #tpu.memory_space<vmem>>, vector<1x8x1xf32>,
    %8 = arith.mulf %2, %2 : vector<8x128xf32>
    %cst_9 = arith.constant dense<0.000000e+00> : vector<8xf32>
    %9 = vector.multi_reduction <add>, %8, %cst_9 [1] : vector<8x128xf32> to vector<8xf32>
    %10 = vector.shape_cast %9 : vector<8xf32> to vector<8x1xf32>
    %11 = vector.shape_cast %10 : vector<8x1xf32> to vector<1x8x1xf32>
    %c0_10 = arith.constant 0 : index
    %c0_11 = arith.constant 0 : index
    %c0_12 = arith.constant 0 : index
    %12 = vector.load %arg5[%c0_10, %c0_11, %c0_12] : memref<1x8x1xf32, #tpu.memory_space<vmem>>, vector<1x8x1xf32>
    tpu.vector_store %arg5[%c0_10, %c0_11, %c0_12], %11 {strides = array<i32>} : memref<1x8x1xf32, #tpu.memory_space<vmem>>, vector<1x8x1xf32>,
    return
  }
  func.func @transform_0(%arg0: i32) -> (i32, i32) {
    %c0_i32 = arith.constant 0 : i32
    %c0_i32_0 = arith.constant 0 : i32
    %c0_i32_1 = arith.constant 0 : i32
    return %c0_i32, %c0_i32_0 : i32, i32
  }
  func.func @transform_1(%arg0: i32) -> (i32, i32) {
    %c0_i32 = arith.constant 0 : i32
    %c0_i32_0 = arith.constant 0 : i32
    return %c0_i32, %arg0 : i32, i32
  }
  func.func @transform_2(%arg0: i32) -> (i32, i32) {
    %c0_i32 = arith.constant 0 : i32
    %c0_i32_0 = arith.constant 0 : i32
    return %c0_i32, %arg0 : i32, i32
  }
  func.func @transform_3(%arg0: i32) -> (i32, i32, i32) {
    %c0_i32 = arith.constant 0 : i32
    %c0_i32_0 = arith.constant 0 : i32
    %c0_i32_1 = arith.constant 0 : i32
    return %arg0, %c0_i32, %c0_i32_0 : i32, i32, i32
  }
  func.func @transform_4(%arg0: i32) -> (i32, i32, i32) {
    %c0_i32 = arith.constant 0 : i32
    %c0_i32_0 = arith.constant 0 : i32
    %c0_i32_1 = arith.constant 0 : i32
    return %arg0, %c0_i32, %c0_i32_0 : i32, i32, i32
  }
}

module attributes {stable_mosaic.version = 11 : i64} {
  func.func @kernel(%arg0: i32, %arg1: memref<8x128xf32, #tpu.memory_space<vmem>>, %arg2: memref<8x1xf32, #tpu.memory_space<vmem>>, %arg3: memref<8x1xf32, #tpu.memory_space<vmem>>, %arg4: memref<8x128xf32, #tpu.memory_space<vmem>>) attributes {dimension_semantics = [#tpu.dimension_semantics<parallel>], iteration_bounds = array<i64: 4>, scalar_prefetch = 0 : i64, scratch_operands = 0 : i64, tpu.core_type = #tpu.core_type<tc>, window_params = [{transform_indices = @transform_0, window_bounds = array<i64: 8, 128>}, {pipeline_mode = #tpu.pipeline_mode<synchronous>, transform_indices = @transform_1, window_bounds = array<i64: 8, 1>}, {pipeline_mode = #tpu.pipeline_mode<synchronous>, transform_indices = @transform_2, window_bounds = array<i64: 8, 1>}, {transform_indices = @transform_3, window_bounds = array<i64: 8, 128>}]} {
    %c0 = arith.constant 0 : index
    %c0_0 = arith.constant 0 : index
    %0 = vector.load %arg1[%c0, %c0_0] : memref<8x128xf32, #tpu.memory_space<vmem>>, vector<8x128xf32>
    %c0_1 = arith.constant 0 : index
    %c0_2 = arith.constant 0 : index
    %1 = vector.load %arg2[%c0_1, %c0_2] : memref<8x1xf32, #tpu.memory_space<vmem>>, vector<8x1xf32>
    %2 = vector.broadcast %1 : vector<8x1xf32> to vector<8x128xf32>
    %3 = arith.mulf %0, %2 : vector<8x128xf32>
    %c0_3 = arith.constant 0 : index
    %c0_4 = arith.constant 0 : index
    %4 = vector.load %arg3[%c0_3, %c0_4] : memref<8x1xf32, #tpu.memory_space<vmem>>, vector<8x1xf32>
    %5 = vector.broadcast %4 : vector<8x1xf32> to vector<8x128xf32>
    %6 = arith.addf %3, %5 : vector<8x128xf32>
    %cst = arith.constant 0.000000e+00 : f32
    %7 = vector.broadcast %cst : f32 to vector<8x128xf32>
    %8 = arith.cmpf oge, %6, %7 : vector<8x128xf32>
    %cst_5 = arith.constant 5.000000e-01 : f32
    %9 = vector.broadcast %cst_5 : f32 to vector<8x128xf32>
    %10 = arith.mulf %9, %6 : vector<8x128xf32>
    %11 = arith.select %8, %6, %10 : vector<8x128xi1>, vector<8x128xf32>
    %c0_6 = arith.constant 0 : index
    %c0_7 = arith.constant 0 : index
    %12 = vector.load %arg4[%c0_6, %c0_7] : memref<8x128xf32, #tpu.memory_space<vmem>>, vector<8x128xf32>
    tpu.vector_store %arg4[%c0_6, %c0_7], %11 {strides = array<i32>} : memref<8x128xf32, #tpu.memory_space<vmem>>, vector<8x128xf32>,
    return
  }
  func.func @transform_0(%arg0: i32) -> (i32, i32) {
    %c0_i32 = arith.constant 0 : i32
    %c0_i32_0 = arith.constant 0 : i32
    return %c0_i32, %arg0 : i32, i32
  }
  func.func @transform_1(%arg0: i32) -> (i32, i32) {
    %c0_i32 = arith.constant 0 : i32
    %c0_i32_0 = arith.constant 0 : i32
    %c0_i32_1 = arith.constant 0 : i32
    return %c0_i32, %c0_i32_0 : i32, i32
  }
  func.func @transform_2(%arg0: i32) -> (i32, i32) {
    %c0_i32 = arith.constant 0 : i32
    %c0_i32_0 = arith.constant 0 : i32
    %c0_i32_1 = arith.constant 0 : i32
    return %c0_i32, %c0_i32_0 : i32, i32
  }
  func.func @transform_3(%arg0: i32) -> (i32, i32) {
    %c0_i32 = arith.constant 0 : i32
    %c0_i32_0 = arith.constant 0 : i32
    return %c0_i32, %arg0 : i32, i32
  }
}

module attributes {stable_mosaic.version = 11 : i64} {
  func.func @_conv_gemm_stats_kernel(%arg0: i32, %arg1: memref<4x72xbf16, #tpu.memory_space<vmem>>, %arg2: memref<72x128xbf16, #tpu.memory_space<vmem>>, %arg3: memref<4x128xf32, #tpu.memory_space<vmem>>, %arg4: memref<1x4x1xf32, #tpu.memory_space<vmem>>, %arg5: memref<1x4x1xf32, #tpu.memory_space<vmem>>) attributes {dimension_semantics = [#tpu.dimension_semantics<parallel>], iteration_bounds = array<i64: 4>, scalar_prefetch = 0 : i64, scratch_operands = 0 : i64, tpu.core_type = #tpu.core_type<tc>, window_params = [{pipeline_mode = #tpu.pipeline_mode<synchronous>, transform_indices = @transform_0, window_bounds = array<i64: 4, 72>}, {transform_indices = @transform_1, window_bounds = array<i64: 72, 128>}, {transform_indices = @transform_2, window_bounds = array<i64: 4, 128>}, {transform_indices = @transform_3, window_bounds = array<i64: 1, 4, 1>}, {transform_indices = @transform_4, window_bounds = array<i64: 1, 4, 1>}]} {
    %c0 = arith.constant 0 : index
    %c0_0 = arith.constant 0 : index
    %0 = vector.load %arg1[%c0, %c0_0] : memref<4x72xbf16, #tpu.memory_space<vmem>>, vector<4x72xbf16>
    %c0_1 = arith.constant 0 : index
    %c0_2 = arith.constant 0 : index
    %1 = vector.load %arg2[%c0_1, %c0_2] : memref<72x128xbf16, #tpu.memory_space<vmem>>, vector<72x128xbf16>
    %cst = arith.constant dense<0.000000e+00> : vector<4x128xf32>
    %2 = tpu.matmul %0, %1, %cst {dimension_numbers = #tpu.dot_dimension_numbers<[1], [0], [0], [1], [0, 0, 1, 1], [], []>} : vector<4x72xbf16>, vector<72x128xbf16>, vector<4x128xf32> -> vector<4x128xf32>
    %c0_3 = arith.constant 0 : index
    %c0_4 = arith.constant 0 : index
    %3 = vector.load %arg3[%c0_3, %c0_4] : memref<4x128xf32, #tpu.memory_space<vmem>>, vector<4x128xf32>
    tpu.vector_store %arg3[%c0_3, %c0_4], %2 {strides = array<i32>} : memref<4x128xf32, #tpu.memory_space<vmem>>, vector<4x128xf32>,
    %cst_5 = arith.constant dense<0.000000e+00> : vector<4xf32>
    %4 = vector.multi_reduction <add>, %2, %cst_5 [1] : vector<4x128xf32> to vector<4xf32>
    %5 = vector.shape_cast %4 : vector<4xf32> to vector<4x1xf32>
    %6 = vector.shape_cast %5 : vector<4x1xf32> to vector<1x4x1xf32>
    %c0_6 = arith.constant 0 : index
    %c0_7 = arith.constant 0 : index
    %c0_8 = arith.constant 0 : index
    %7 = vector.load %arg4[%c0_6, %c0_7, %c0_8] : memref<1x4x1xf32, #tpu.memory_space<vmem>>, vector<1x4x1xf32>
    tpu.vector_store %arg4[%c0_6, %c0_7, %c0_8], %6 {strides = array<i32>} : memref<1x4x1xf32, #tpu.memory_space<vmem>>, vector<1x4x1xf32>,
    %8 = arith.mulf %2, %2 : vector<4x128xf32>
    %cst_9 = arith.constant dense<0.000000e+00> : vector<4xf32>
    %9 = vector.multi_reduction <add>, %8, %cst_9 [1] : vector<4x128xf32> to vector<4xf32>
    %10 = vector.shape_cast %9 : vector<4xf32> to vector<4x1xf32>
    %11 = vector.shape_cast %10 : vector<4x1xf32> to vector<1x4x1xf32>
    %c0_10 = arith.constant 0 : index
    %c0_11 = arith.constant 0 : index
    %c0_12 = arith.constant 0 : index
    %12 = vector.load %arg5[%c0_10, %c0_11, %c0_12] : memref<1x4x1xf32, #tpu.memory_space<vmem>>, vector<1x4x1xf32>
    tpu.vector_store %arg5[%c0_10, %c0_11, %c0_12], %11 {strides = array<i32>} : memref<1x4x1xf32, #tpu.memory_space<vmem>>, vector<1x4x1xf32>,
    return
  }
  func.func @transform_0(%arg0: i32) -> (i32, i32) {
    %c0_i32 = arith.constant 0 : i32
    %c0_i32_0 = arith.constant 0 : i32
    %c0_i32_1 = arith.constant 0 : i32
    return %c0_i32, %c0_i32_0 : i32, i32
  }
  func.func @transform_1(%arg0: i32) -> (i32, i32) {
    %c0_i32 = arith.constant 0 : i32
    %c0_i32_0 = arith.constant 0 : i32
    return %c0_i32, %arg0 : i32, i32
  }
  func.func @transform_2(%arg0: i32) -> (i32, i32) {
    %c0_i32 = arith.constant 0 : i32
    %c0_i32_0 = arith.constant 0 : i32
    return %c0_i32, %arg0 : i32, i32
  }
  func.func @transform_3(%arg0: i32) -> (i32, i32, i32) {
    %c0_i32 = arith.constant 0 : i32
    %c0_i32_0 = arith.constant 0 : i32
    %c0_i32_1 = arith.constant 0 : i32
    return %arg0, %c0_i32, %c0_i32_0 : i32, i32, i32
  }
  func.func @transform_4(%arg0: i32) -> (i32, i32, i32) {
    %c0_i32 = arith.constant 0 : i32
    %c0_i32_0 = arith.constant 0 : i32
    %c0_i32_1 = arith.constant 0 : i32
    return %arg0, %c0_i32, %c0_i32_0 : i32, i32, i32
  }
}

module attributes {stable_mosaic.version = 11 : i64} {
  func.func @kernel(%arg0: i32, %arg1: memref<8x128xf32, #tpu.memory_space<vmem>>, %arg2: memref<8x128xf32, #tpu.memory_space<vmem>>, %arg3: memref<8x1xf32, #tpu.memory_space<vmem>>, %arg4: memref<8x1xf32, #tpu.memory_space<vmem>>, %arg5: memref<8x128xf32, #tpu.memory_space<vmem>>) attributes {dimension_semantics = [#tpu.dimension_semantics<parallel>], iteration_bounds = array<i64: 2>, scalar_prefetch = 0 : i64, scratch_operands = 0 : i64, tpu.core_type = #tpu.core_type<tc>, window_params = [{transform_indices = @transform_0, window_bounds = array<i64: 8, 128>}, {transform_indices = @transform_1, window_bounds = array<i64: 8, 128>}, {pipeline_mode = #tpu.pipeline_mode<synchronous>, transform_indices = @transform_2, window_bounds = array<i64: 8, 1>}, {pipeline_mode = #tpu.pipeline_mode<synchronous>, transform_indices = @transform_3, window_bounds = array<i64: 8, 1>}, {transform_indices = @transform_4, window_bounds = array<i64: 8, 128>}]} {
    %c0 = arith.constant 0 : index
    %c0_0 = arith.constant 0 : index
    %0 = vector.load %arg1[%c0, %c0_0] : memref<8x128xf32, #tpu.memory_space<vmem>>, vector<8x128xf32>
    %c0_1 = arith.constant 0 : index
    %c0_2 = arith.constant 0 : index
    %1 = vector.load %arg3[%c0_1, %c0_2] : memref<8x1xf32, #tpu.memory_space<vmem>>, vector<8x1xf32>
    %2 = vector.broadcast %1 : vector<8x1xf32> to vector<8x128xf32>
    %3 = arith.mulf %0, %2 : vector<8x128xf32>
    %c0_3 = arith.constant 0 : index
    %c0_4 = arith.constant 0 : index
    %4 = vector.load %arg4[%c0_3, %c0_4] : memref<8x1xf32, #tpu.memory_space<vmem>>, vector<8x1xf32>
    %5 = vector.broadcast %4 : vector<8x1xf32> to vector<8x128xf32>
    %6 = arith.addf %3, %5 : vector<8x128xf32>
    %cst = arith.constant 0.000000e+00 : f32
    %7 = vector.broadcast %cst : f32 to vector<8x128xf32>
    %8 = arith.cmpf oge, %6, %7 : vector<8x128xf32>
    %cst_5 = arith.constant 5.000000e-01 : f32
    %9 = vector.broadcast %cst_5 : f32 to vector<8x128xf32>
    %10 = arith.mulf %9, %6 : vector<8x128xf32>
    %11 = arith.select %8, %6, %10 : vector<8x128xi1>, vector<8x128xf32>
    %c0_6 = arith.constant 0 : index
    %c0_7 = arith.constant 0 : index
    %12 = vector.load %arg2[%c0_6, %c0_7] : memref<8x128xf32, #tpu.memory_space<vmem>>, vector<8x128xf32>
    %13 = arith.addf %11, %12 : vector<8x128xf32>
    %c0_8 = arith.constant 0 : index
    %c0_9 = arith.constant 0 : index
    %14 = vector.load %arg5[%c0_8, %c0_9] : memref<8x128xf32, #tpu.memory_space<vmem>>, vector<8x128xf32>
    tpu.vector_store %arg5[%c0_8, %c0_9], %13 {strides = array<i32>} : memref<8x128xf32, #tpu.memory_space<vmem>>, vector<8x128xf32>,
    return
  }
  func.func @transform_0(%arg0: i32) -> (i32, i32) {
    %c0_i32 = arith.constant 0 : i32
    %c0_i32_0 = arith.constant 0 : i32
    return %c0_i32, %arg0 : i32, i32
  }
  func.func @transform_1(%arg0: i32) -> (i32, i32) {
    %c0_i32 = arith.constant 0 : i32
    %c0_i32_0 = arith.constant 0 : i32
    return %c0_i32, %arg0 : i32, i32
  }
  func.func @transform_2(%arg0: i32) -> (i32, i32) {
    %c0_i32 = arith.constant 0 : i32
    %c0_i32_0 = arith.constant 0 : i32
    %c0_i32_1 = arith.constant 0 : i32
    return %c0_i32, %c0_i32_0 : i32, i32
  }
  func.func @transform_3(%arg0: i32) -> (i32, i32) {
    %c0_i32 = arith.constant 0 : i32
    %c0_i32_0 = arith.constant 0 : i32
    %c0_i32_1 = arith.constant 0 : i32
    return %c0_i32, %c0_i32_0 : i32, i32
  }
  func.func @transform_4(%arg0: i32) -> (i32, i32) {
    %c0_i32 = arith.constant 0 : i32
    %c0_i32_0 = arith.constant 0 : i32
    return %c0_i32, %arg0 : i32, i32
  }
}

</mosaic_0001>

<bundles_post_ra>
// kernel: mul.47
= control target key start
LH: loop header
LB: loop body
LE: loop exit
PB: predicated region body
PF: predicated region fallthrough
CT: control target
= control target key end

     0   :  { %s34_s0 = inlined_call_operand.vmem [shape: f32[8,1], index: 0, kind: input, shape index: {}]   ;;  %s35_s1 = inlined_call_operand.vmem [shape: f32[8,1], index: 1, kind: input, shape index: {}]   ;;  %s36_s2 = inlined_call_operand.vmem [shape: f32[8,1], index: 2, kind: output, shape index: {}]  }
   0x1   :  { %v3_v0 = vld [vmem:[%s34_s0] sm:$0xff] }
   0x2   :  { %v4_v1 = vld [vmem:[%s35_s1] sm:$0xff] }
   0x3   :  { %v7_v2 = vmul.f32 %v4_v1, %v3_v0 }
   0x5   :  { %9 = vst [vmem:[%s36_s2] sm:$0xff] %v7_v2 }

// kernel: resnet_block_triple_forward.5
= control target key start
LH: loop header
LB: loop body
LE: loop exit
PB: predicated region body
PF: predicated region fallthrough
CT: control target
= control target key end

     0   :  { %s286_s12 = smov 0   ;;  %s309_s0 = inlined_call_operand.vmem [shape: f32[8,512], index: 0, kind: input, shape index: {}]   ;;  %s310_s1 = inlined_call_operand.vmem [shape: f32[8,1], index: 1, kind: input, shape index: {}]   ;;  %s311_s2 = inlined_call_operand.vmem [shape: f32[8,1], index: 2, kind: input, shape index: {}]   ;;  %s312_s3 = inlined_call_operand.vmem [shape: f32[8,512], index: 3, kind: output, shape index: {}]  }
   0x1 LB: > { %s238_s13 = sadd.s32 4294967295, %s263_s12   ;;  %p242_p0 = scmp.ge.s32.totalorder %s263_s12, 1  ;;  %s263_s12 = sphi %s286_s12, %s13_s12  }
   0x2   : > { %p136_p1 = scmp.lt.s32.totalorder %s263_s12, 5 }
   0x4   : > { %p137_p2 = pnand %p242_p0, %p136_p1 }
   0x5   : > { %v167_v0 = vld [vmem:[%s310_s1] sm:$0xff] (!%p137_p2)  ;;  %v265_v1 = vmov (!%p137_p2), 0   ;;  %p158_p3 = scmp.lt.s32.totalorder (!%p137_p2), %s238_s13, 3 }
   0x6   : > { %140 = sbr.rel (%p137_p2) target bundleno = 145 (0x91), region = 32  ;;  %256 = vset.pattern.permute.xlu0 (!%p137_p2), %v265_v1  ;;  %v174_v2 = vld [vmem:[%s311_s2] sm:$0xff] (!%p137_p2) }
   0x7   : > { %170 = vperm.xlu0 (!%p137_p2), %256, %v167_v0  }
   0xb   : > { %177 = vperm.xlu0 (!%p137_p2), %256, %v174_v2  }
   0xd   : > { %s314_s13 = smov (!%p158_p3, %s238_s13), 3 }
   0xe   : > { %s243_s18 = sshll.u32 %s314_s13, 3 }
   0xf   : > { %s161_s21 = scalar_lea.vmem %s309_s0, %s243_s18  ;;  %s165_s24 = scalar_lea.vmem %s312_s3, %s243_s18 }
  0x10   : > { %v166_v4 = vld [vmem:[%s161_s21] sm:$0xff] }
  0x86   : > { %v171_v3 = vpop.permute.xlu0 %170 }
  0x87   : > { %v173_v5 = vmul.f32 %v171_v3, %v166_v4 }
  0x8a   : > { %v178_v6 = vpop.permute.xlu0 %177 }
  0x8b   : > { %v180_v7 = vadd.f32 %v178_v6, %v173_v5 }
  0x8d   : > { %vm181_vm0 = vcmp.ge.f32.partialorder %v180_v7, 0.0  ;;  %v182_v8 = vmul.f32 0.5, %v180_v7 }
  0x8f   : > { %v183_v9 = vsel %vm181_vm0, %v180_v7, %v182_v8 }
  0x90   : > { %184 = vst [vmem:[%s165_s24] sm:$0xff] %v183_v9 }
  0x91 PF: > { %s13_s12 = sadd.s32 1, %s263_s12  }
  0x92   : > { %p10_p4 = scmp.ge.s32.totalorder %s13_s12, 6  }
  0x94   :  { %12 = sbr.rel (!%p10_p4) target bundleno = 1 (0x1), region = 62 }

// kernel: resnet_block_triple_forward.4
= control target key start
LH: loop header
LB: loop body
LE: loop exit
PB: predicated region body
PF: predicated region fallthrough
CT: control target
= control target key end

     0   :  { %s585_s15 = smov 0   ;;  %s587_s16 = smov 0   ;;  %s648_s0 = inlined_call_operand.vmem [shape: bf16[8,36], index: 0, kind: input, shape index: {}]   ;;  %s649_s1 = inlined_call_operand.vmem [shape: bf16[36,512], index: 1, kind: input, shape index: {}]   ;;  %s650_s2 = inlined_call_operand.vmem [shape: f32[8,512], index: 2, kind: output, shape index: {0}]   ;;  %s651_s3 = inlined_call_operand.vmem [shape: f32[4,8,1], index: 3, kind: output, shape index: {1}]   ;;  %s652_s4 = inlined_call_operand.vmem [shape: f32[4,8,1], index: 4, kind: output, shape index: {2}]  }
   0x1   :  { %s589_s17 = smov 0  }
   0x2 LB: > { %s474_s18 = sadd.s32 4294967295, %s556_s17   ;;  %s602_s19 = sadd.s32 1, %s556_s17   ;;  %s556_s17 = sphi %s589_s17, %s655_s17   ;;  %s552_s16 = sphi %s587_s16, %s654_s16   ;;  %s548_s15 = sphi %s585_s15, %s653_s15  }
   0x3   : > { %s40_s20 = ssub.s32 %s556_s17, %s602_s19  ;;  %s43_s21 = sadd.s32 1, %s552_s16 }
   0x4   : > { %p41_p0 = scmp.eq.s32.totalorder %s40_s20, 0  ;;  %p50_p1 = scmp.ne.s32.totalorder %s552_s16, %s548_s15 }
   0x5   : > { %p51_p2 = scmp.eq.s32.totalorder %s556_s17, 0  ;;  %p477_p4 = scmp.ge.s32.totalorder %s556_s17, 4 }
   0x6   : > { %s611_s22 = scalar_select %p41_p0, %s552_s16, %s43_s21  }
   0x7   : > { %p52_p3 = por %p51_p2, %p50_p1  ;;  %157 = sbr.rel (%p477_p4) target bundleno = 21 (0x15), region = 20 }
   0xe   : > { %160 = sbr.rel (!%p52_p3) target bundleno = 21 (0x15), region = 24  ;;  %s162_s23 = sand.u32 (%p52_p3), 1, %s552_s16  }
   0xf   : > { %s478_s24 = sshll.u32 (%p52_p3), %s556_s17, 2  ;;  %s503_s25 = smul.u32 (%p52_p3), 20, %s162_s23 }
  0x10   : > { %s166_s28 = scalar_lea.vmem (%p52_p3), %s649_s1, %s478_s24 }
  0x11   : > { %v182_v0 = vld [vmem:[%s166_s28] sm:$0xf] (%p52_p3)  ;;  %v184_v1 = vld [vmem:[%s166_s28 + $0x10] sm:$0xf] (%p52_p3)  ;;  %s164_s29 = scalar_lea.vmem (%p52_p3), [#allocation2], %s503_s25 }
  0x12   : > { %v186_v2 = vld [vmem:[%s166_s28 + $0x20] sm:$0xf] (%p52_p3)  ;;  %v188_v3 = vld [vmem:[%s166_s28 + $0x30] sm:$0xf] (%p52_p3)  ;;  %183 = vst [vmem:[%s164_s29] sm:$0xf] (%p52_p3), %v182_v0 }
  0x13   : > { %v190_v4 = vld [vmem:[%s166_s28 + $0x40] sm:$0xf] (%p52_p3)  ;;  %185 = vst [vmem:[%s164_s29 + $0x4] sm:$0xf] (%p52_p3), %v184_v1  ;;  %187 = vst [vmem:[%s164_s29 + $0x8] sm:$0xf] (%p52_p3), %v186_v2 }
  0x14   : > { %189 = vst [vmem:[%s164_s29 + $0xc] sm:$0xf] (%p52_p3), %v188_v3  ;;  %191 = vst [vmem:[%s164_s29 + $0x10] sm:$0xf] (%p52_p3), %v190_v4 }
  0x15 PF: > { %p479_p5 = scmp.ge.s32.totalorder %s556_s17, 1  ;;  %p223_p6 = scmp.lt.s32.totalorder %s556_s17, 5 }
  0x17   : > { %p224_p7 = pnand %p479_p5, %p223_p6 }
  0x18   : > { %s230_s30 = sand.u32 (!%p224_p7), 1, %s548_s15   ;;  %v558_v5 = vmov (!%p224_p7), 0.0   ;;  %vm559_vm0 = vmmov (!%p224_p7), 0   ;;  %vm300_vm1 = vcmask (!%p224_p7), 1041408   ;;  %v275_v10 = vld [vmem:[%s648_s0] sm:$0xf] (!%p224_p7) }
  0x19   : > { %227 = sbr.rel (%p224_p7) target bundleno = 400 (0x190), region = 65  ;;  %493 = vmatprep.subr.bf16.mxu0 (!%p224_p7), %v558_v5  ;;  %499 = vmatprep.mubr.msk.bf16.mxu0 (!%p224_p7), %vm559_vm0, %v558_v5  ;;  %vm296_vm2 = vcmask (!%p224_p7), 293888   ;;  %p262_p8 = scmp.lt.s32.totalorder (!%p224_p7), %s474_s18, 3  ;;  %vm347_vm3 = vcmask (!%p224_p7), 7168  }
  0x1a   : > { %s504_s5 = smul.u32 (!%p224_p7), 20, %s230_s30 }
  0x1c   : > { %s232_s6 = scalar_lea.vmem (!%p224_p7), [#allocation2], %s504_s5 }
  0x1d   : > { %v531_v6 = vld [vmem:[%s232_s6] sm:$0xff] (!%p224_p7)   ;;  %v532_v7 = vld [vmem:[%s232_s6 + $0x8] sm:$0xff] (!%p224_p7)   ;;  %v533_v8 = vld [vmem:[%s232_s6 + $0x10] ss:$0 sps:$4 sm:$0x33] (!%p224_p7)  }
  0x1e   : > { %494 = vmatpush3.bf16.msra.mxu0 (!%p224_p7), %v531_v6  ;;  %v302_v9 = vsel (!%p224_p7), %vm300_vm1, %v533_v8, 0 }
  0x1f   : > { %495 = vmatprep.subr.bf16.mxu0 (!%p224_p7), %v558_v5 }
  0x20   : > { %s657_s18 = smov (!%p262_p8, %s474_s18), 3 }
  0x21   : > { %s480_s9 = sshll.u32 %s657_s18, 3 }
  0x22   : > { %496 = vmatpush3.bf16.msra.mxu0 %v532_v7  ;;  %s265_s12 = scalar_lea.vmem %s650_s2, %s480_s9  ;;  %s269_s15 = scalar_lea.vmem %s651_s3, %s480_s9 }
  0x23   : > { %497 = vmatprep.subr.bf16.mxu0 %v558_v5  ;;  %s273_s20 = scalar_lea.vmem %s652_s4, %s480_s9 }
  0x26   : > { %498 = vmatpush3.bf16.msra.mxu0 %v302_v9 }
  0x29   : > { %500 = vmatmul.mubr.msk.bf16.vlgmr.msra.gmra.mrb[0].mxu0 %vm296_vm2, %v275_v10 }
  0xfc   : > { %v338_v11 = vpop.f32.mrb[0].mxu0 }
  0xfd   : > { %344 = vst [vmem:[%s265_s12] sm:$0xff] %v338_v11  ;;  %345 = vadd.xlane.f32.xlu0 %v338_v11  ;;  %v501_v12 = vpop.f32.mrb[1].mxu0  ;;  %v349_v15 = vmul.f32 %v338_v11, %v338_v11 }
  0xfe   : > { %v341_v13 = vpop.f32.mrb[2].mxu0 }
  0xff   : > { %v502_v14 = vpop.f32.mrb[3].mxu0 }
 0x101   : > { %350 = vadd.xlane.f32.xlu0 %v349_v15 }
 0x18a   : > { %v346_v16 = vpop.xlane.xlu0 %345 }
 0x18b   : > { %348 = vst.msk [vmem:[%s269_s15] sm:$0xff] %vm347_vm3, %v346_v16 }
 0x18e   : > { %v351_v17 = vpop.xlane.xlu0 %350 }
 0x18f   : > { %352 = vst.msk [vmem:[%s273_s20] sm:$0xff] %vm347_vm3, %v351_v17 }
 0x190 PF: > { %p12_p9 = scmp.ge.s32.totalorder %s602_s19, 6   ;;  %s653_s15 = smov %s552_s16 }
 0x191   : > { %s654_s16 = smov %s611_s22  ;;  %s655_s17 = smov %s602_s19 }
 0x192   :  { %14 = sbr.rel (!%p12_p9) target bundleno = 2 (0x2), region = 128 }

// kernel: resnet_block_triple_forward.6
= control target key start
LH: loop header
LB: loop body
LE: loop exit
PB: predicated region body
PF: predicated region fallthrough
CT: control target
= control target key end

     0   :  { %s629_s15 = smov 0   ;;  %s631_s16 = smov 0   ;;  %s695_s0 = inlined_call_operand.vmem [shape: bf16[4,72], index: 0, kind: input, shape index: {}]   ;;  %s696_s1 = inlined_call_operand.vmem [shape: bf16[72,512], index: 1, kind: input, shape index: {}]   ;;  %s697_s2 = inlined_call_operand.vmem [shape: f32[4,512], index: 2, kind: output, shape index: {0}]   ;;  %s698_s3 = inlined_call_operand.vmem [shape: f32[4,4,1], index: 3, kind: output, shape index: {1}]   ;;  %s699_s4 = inlined_call_operand.vmem [shape: f32[4,4,1], index: 4, kind: output, shape index: {2}]  }
   0x1   :  { %s633_s17 = smov 0  }
   0x2 LB: > { %s508_s18 = sadd.s32 4294967295, %s600_s17   ;;  %s646_s19 = sadd.s32 1, %s600_s17   ;;  %s600_s17 = sphi %s633_s17, %s702_s17   ;;  %s596_s16 = sphi %s631_s16, %s701_s16   ;;  %s592_s15 = sphi %s629_s15, %s700_s15  }
   0x3   : > { %s40_s20 = ssub.s32 %s600_s17, %s646_s19  ;;  %s43_s21 = sadd.s32 1, %s596_s16 }
   0x4   : > { %p41_p0 = scmp.eq.s32.totalorder %s40_s20, 0  ;;  %p50_p1 = scmp.ne.s32.totalorder %s596_s16, %s592_s15 }
   0x5   : > { %p51_p2 = scmp.eq.s32.totalorder %s600_s17, 0  ;;  %p511_p4 = scmp.ge.s32.totalorder %s600_s17, 4 }
   0x6   : > { %s655_s22 = scalar_select %p41_p0, %s596_s16, %s43_s21  }
   0x7   : > { %p52_p3 = por %p51_p2, %p50_p1  ;;  %157 = sbr.rel (%p511_p4) target bundleno = 24 (0x18), region = 20 }
   0xe   : > { %160 = sbr.rel (!%p52_p3) target bundleno = 24 (0x18), region = 24  ;;  %s162_s23 = sand.u32 (%p52_p3), 1, %s596_s16  }
   0xf   : > { %s512_s24 = sshll.u32 (%p52_p3), %s600_s17, 2  ;;  %s545_s25 = smul.u32 (%p52_p3), 36, %s162_s23 }
  0x10   : > { %s166_s28 = scalar_lea.vmem (%p52_p3), %s696_s1, %s512_s24 }
  0x11   : > { %v182_v0 = vld [vmem:[%s166_s28] sm:$0xf] (%p52_p3)  ;;  %v184_v1 = vld [vmem:[%s166_s28 + $0x10] sm:$0xf] (%p52_p3)  ;;  %s164_s29 = scalar_lea.vmem (%p52_p3), [#allocation2], %s545_s25 }
  0x12   : > { %v186_v2 = vld [vmem:[%s166_s28 + $0x20] sm:$0xf] (%p52_p3)  ;;  %v188_v3 = vld [vmem:[%s166_s28 + $0x30] sm:$0xf] (%p52_p3)  ;;  %183 = vst [vmem:[%s164_s29] sm:$0xf] (%p52_p3), %v182_v0 }
  0x13   : > { %v190_v4 = vld [vmem:[%s166_s28 + $0x40] sm:$0xf] (%p52_p3)  ;;  %185 = vst [vmem:[%s164_s29 + $0x4] sm:$0xf] (%p52_p3), %v184_v1  ;;  %187 = vst [vmem:[%s164_s29 + $0x8] sm:$0xf] (%p52_p3), %v186_v2 }
  0x14   : > { %189 = vst [vmem:[%s164_s29 + $0xc] sm:$0xf] (%p52_p3), %v188_v3  ;;  %191 = vst [vmem:[%s164_s29 + $0x10] sm:$0xf] (%p52_p3), %v190_v4  ;;  %v192_v5 = vld [vmem:[%s166_s28 + $0x50] sm:$0xf] (%p52_p3) }
  0x15   : > { %v194_v6 = vld [vmem:[%s166_s28 + $0x60] sm:$0xf]  ;;  %v196_v7 = vld [vmem:[%s166_s28 + $0x70] sm:$0xf]  ;;  %193 = vst [vmem:[%s164_s29 + $0x14] sm:$0xf] %v192_v5 }
  0x16   : > { %195 = vst [vmem:[%s164_s29 + $0x18] sm:$0xf] %v194_v6  ;;  %197 = vst [vmem:[%s164_s29 + $0x1c] sm:$0xf] %v196_v7  ;;  %v198_v8 = vld [vmem:[%s166_s28 + $0x80] sm:$0xf] }
  0x17   : > { %199 = vst [vmem:[%s164_s29 + $0x20] sm:$0xf] %v198_v8 }
  0x18 PF: > { %p513_p5 = scmp.ge.s32.totalorder %s600_s17, 1  ;;  %p239_p6 = scmp.lt.s32.totalorder %s600_s17, 5 }
  0x1a   : > { %p240_p7 = pnand %p513_p5, %p239_p6 }
  0x1b   : > { %s246_s30 = sand.u32 (!%p240_p7), 1, %s592_s15   ;;  %v602_v9 = vmov (!%p240_p7), 0.0   ;;  %vm603_vm0 = vmmov (!%p240_p7), 0   ;;  %vm332_vm1 = vcmask (!%p240_p7), 1043456   ;;  %v291_v16 = vld [vmem:[%s695_s0] sm:$0x3] (!%p240_p7) }
  0x1c   : > { %243 = sbr.rel (%p240_p7) target bundleno = 412 (0x19c), region = 65  ;;  %531 = vmatprep.subr.bf16.mxu0 (!%p240_p7), %v602_v9  ;;  %541 = vmatprep.mubr.msk.bf16.mxu0 (!%p240_p7), %vm603_vm0, %v602_v9  ;;  %vm328_vm2 = vcmask (!%p240_p7), 588800   ;;  %p278_p8 = scmp.lt.s32.totalorder (!%p240_p7), %s508_s18, 3  ;;  %vm380_vm3 = vcmask (!%p240_p7), 3072  }
  0x1d   : > { %s546_s5 = smul.u32 (!%p240_p7), 36, %s246_s30 }
  0x1f   : > { %s248_s6 = scalar_lea.vmem (!%p240_p7), [#allocation2], %s546_s5 }
  0x20   : > { %v573_v10 = vld [vmem:[%s248_s6] sm:$0xff] (!%p240_p7)   ;;  %v574_v11 = vld [vmem:[%s248_s6 + $0x8] sm:$0xff] (!%p240_p7)   ;;  %v575_v12 = vld [vmem:[%s248_s6 + $0x10] sm:$0xff] (!%p240_p7)  }
  0x21   : > { %532 = vmatpush3.bf16.msra.mxu0 (!%p240_p7), %v573_v10  ;;  %v576_v13 = vld [vmem:[%s248_s6 + $0x18] sm:$0xff] (!%p240_p7)   ;;  %v577_v14 = vld [vmem:[%s248_s6 + $0x20] ss:$0 sps:$4 sm:$0xff] (!%p240_p7)  }
  0x22   : > { %533 = vmatprep.subr.bf16.mxu0 (!%p240_p7), %v602_v9  ;;  %v334_v15 = vsel (!%p240_p7), %vm332_vm1, %v577_v14, 0 }
  0x23   : > { %s704_s18 = smov (!%p278_p8, %s508_s18), 3 }
  0x24   : > { %s514_s9 = sshll.u32 %s704_s18, 2 }
  0x25   : > { %534 = vmatpush3.bf16.msra.mxu0 %v574_v11  ;;  %s281_s12 = scalar_lea.vmem %s697_s2, %s514_s9  ;;  %s285_s15 = scalar_lea.vmem %s698_s3, %s514_s9 }
  0x26   : > { %535 = vmatprep.subr.bf16.mxu0 %v602_v9  ;;  %s289_s20 = scalar_lea.vmem %s699_s4, %s514_s9 }
  0x29   : > { %536 = vmatpush3.bf16.msra.mxu0 %v575_v12 }
  0x2a   : > { %537 = vmatprep.subr.bf16.mxu0 %v602_v9 }
  0x2d   : > { %538 = vmatpush3.bf16.msra.mxu0 %v576_v13 }
  0x2e   : > { %539 = vmatprep.subr.bf16.mxu0 %v602_v9 }
  0x31   : > { %540 = vmatpush3.bf16.msra.mxu0 %v334_v15 }
  0x34   : > { %542 = vmatmul.mubr.msk.bf16.vlgmr.msra.gmra.mrb[0].mxu0 %vm328_vm2, %v291_v16 }
 0x107   : > { %v370_v17 = vpop.f32.mrb[0].mxu0 }
 0x108   : > { %376 = vst [vmem:[%s281_s12] sm:$0xf] %v370_v17  ;;  %v543_v18 = vpop.f32.mrb[1].mxu0  ;;  %v377_v19 = vsel %vm332_vm1, %v370_v17, 0.0  ;;  %v382_v20 = vmul.f32 %v370_v17, %v370_v17 }
 0x109   : > { %378 = vadd.xlane.f32.xlu0 %v377_v19  ;;  %v373_v21 = vpop.f32.mrb[2].mxu0 }
 0x10a   : > { %v544_v22 = vpop.f32.mrb[3].mxu0  ;;  %v383_v23 = vsel %vm332_vm1, %v382_v20, 0.0 }
 0x10d   : > { %384 = vadd.xlane.f32.xlu0 %v383_v23 }
 0x196   : > { %v379_v24 = vpop.xlane.xlu0 %378 }
 0x197   : > { %381 = vst.msk [vmem:[%s285_s15] sm:$0xf] %vm380_vm3, %v379_v24 }
 0x19a   : > { %v385_v25 = vpop.xlane.xlu0 %384 }
 0x19b   : > { %386 = vst.msk [vmem:[%s289_s20] sm:$0xf] %vm380_vm3, %v385_v25 }
 0x19c PF: > { %p12_p9 = scmp.ge.s32.totalorder %s646_s19, 6   ;;  %s700_s15 = smov %s596_s16 }
 0x19d   : > { %s701_s16 = smov %s655_s22  ;;  %s702_s17 = smov %s646_s19 }
 0x19e   :  { %14 = sbr.rel (!%p12_p9) target bundleno = 2 (0x2), region = 128 }

// kernel: resnet_block_triple_forward.7
= control target key start
LH: loop header
LB: loop body
LE: loop exit
PB: predicated region body
PF: predicated region fallthrough
CT: control target
= control target key end

     0   :  { %s350_s15 = smov 0   ;;  %s376_s0 = inlined_call_operand.vmem [shape: f32[8,256], index: 0, kind: input, shape index: {}]   ;;  %s377_s1 = inlined_call_operand.vmem [shape: f32[8,256], index: 1, kind: input, shape index: {}]   ;;  %s378_s2 = inlined_call_operand.vmem [shape: f32[8,1], index: 2, kind: input, shape index: {}]   ;;  %s379_s3 = inlined_call_operand.vmem [shape: f32[8,1], index: 3, kind: input, shape index: {}]   ;;  %s380_s4 = inlined_call_operand.vmem [shape: f32[8,256], index: 4, kind: output, shape index: {}]  }
   0x1 LB: > { %s296_s16 = sadd.s32 4294967295, %s322_s15   ;;  %p300_p0 = scmp.ge.s32.totalorder %s322_s15, 1  ;;  %s322_s15 = sphi %s350_s15, %s14_s15  }
   0x2   : > { %p170_p1 = scmp.lt.s32.totalorder %s322_s15, 3 }
   0x4   : > { %p171_p2 = pnand %p300_p0, %p170_p1 }
   0x5   : > { %v211_v0 = vld [vmem:[%s378_s2] sm:$0xff] (!%p171_p2)  ;;  %v324_v1 = vmov (!%p171_p2), 0   ;;  %p198_p3 = scmp.lt.s32.totalorder (!%p171_p2), %s296_s16, 1 }
   0x6   : > { %174 = sbr.rel (%p171_p2) target bundleno = 147 (0x93), region = 36  ;;  %315 = vset.pattern.permute.xlu0 (!%p171_p2), %v324_v1  ;;  %v218_v2 = vld [vmem:[%s379_s3] sm:$0xff] (!%p171_p2) }
   0x7   : > { %214 = vperm.xlu0 (!%p171_p2), %315, %v211_v0  }
   0xb   : > { %221 = vperm.xlu0 (!%p171_p2), %315, %v218_v2  }
   0xd   : > { %s382_s16 = smov (!%p198_p3, %s296_s16), 1 }
   0xe   : > { %s301_s21 = sshll.u32 %s382_s16, 3 }
   0xf   : > { %s201_s24 = scalar_lea.vmem %s376_s0, %s301_s21  ;;  %s205_s27 = scalar_lea.vmem %s377_s1, %s301_s21 }
  0x10   : > { %v210_v4 = vld [vmem:[%s201_s24] sm:$0xff]  ;;  %s209_s30 = scalar_lea.vmem %s380_s4, %s301_s21 }
  0x11   : > { %v228_v8 = vld [vmem:[%s205_s27] sm:$0xff] }
  0x86   : > { %v215_v3 = vpop.permute.xlu0 %214 }
  0x87   : > { %v217_v5 = vmul.f32 %v215_v3, %v210_v4 }
  0x8a   : > { %v222_v6 = vpop.permute.xlu0 %221 }
  0x8b   : > { %v224_v7 = vadd.f32 %v222_v6, %v217_v5 }
  0x8d   : > { %vm225_vm0 = vcmp.ge.f32.partialorder %v224_v7, 0.0  ;;  %v226_v9 = vmul.f32 0.5, %v224_v7 }
  0x8f   : > { %v227_v10 = vsel %vm225_vm0, %v224_v7, %v226_v9 }
  0x90   : > { %v229_v11 = vadd.f32 %v228_v8, %v227_v10 }
  0x92   : > { %230 = vst [vmem:[%s209_s30] sm:$0xff] %v229_v11 }
  0x93 PF: > { %s14_s15 = sadd.s32 1, %s322_s15  }
  0x94   : > { %p11_p4 = scmp.ge.s32.totalorder %s14_s15, 4  }
  0x96   :  { %13 = sbr.rel (!%p11_p4) target bundleno = 1 (0x1), region = 69 }

</bundles_post_ra>
